<compile_context>
chip_gen: v6e
topology: v6e:2x2x1
jax: 0.10.0
libtpu: 0.0.40
codegen_flags: <defaults>
</compile_context>

<pallas_src>
import jax
import jax.numpy as jnp
from jax.experimental import pallas as pl
from jax.experimental.pallas import tpu as pltpu

# Model dims (from the PyTorch spec).
IN_SIZE = 42
H1 = 3
H2 = 3
H3 = 3
OUT_SIZE = 2

_LANE = 128  # lane-pad width of the packed weight slab


def _round8(n):
    return (n + 7) // 8 * 8


# Static, sublane-aligned row offsets of each weight inside the packed slab.
_W1_OFF = 0
_W2_OFF = _W1_OFF + _round8(IN_SIZE)   # 48
_W3_OFF = _W2_OFF + _round8(H1)        # 56
_W4_OFF = _W3_OFF + _round8(H2)        # 64
_SLAB_ROWS = _W4_OFF + _round8(H3)     # 72


def _mlp_kernel(x_ref, w_ref, o_ref):
    """Fused 4-layer sigmoid MLP on one (TB, 42) batch tile."""
    # Upcast immediately after load (cheap VPU op, hidden under the DMA);
    # all compute stays in f32.
    x = x_ref[...].astype(jnp.float32)

    w = w_ref[...]                             # (72, 128) packed weight slab
    w1 = w[_W1_OFF:_W1_OFF + IN_SIZE, 0:H1]    # (42, 3)  -- already has 1/x_max folded in
    w2 = w[_W2_OFF:_W2_OFF + H1, 0:H2]         # (3, 3)
    w3 = w[_W3_OFF:_W3_OFF + H2, 0:H3]         # (3, 3)
    w4 = w[_W4_OFF:_W4_OFF + H3, 0:OUT_SIZE]   # (3, 2)

    z2 = jax.nn.sigmoid(jnp.dot(x,  w1, preferred_element_type=jnp.float32))
    z4 = jax.nn.sigmoid(jnp.dot(z2, w2, preferred_element_type=jnp.float32))
    z6 = jax.nn.sigmoid(jnp.dot(z4, w3, preferred_element_type=jnp.float32))
    o_ref[...] = jax.nn.sigmoid(
        jnp.dot(z6, w4, preferred_element_type=jnp.float32))


def _pack_weights(w1, w2, w3, w4, inv_scale):
    """Stack the four weights into one sublane-aligned (72, 128) f32 slab.

    1/x_max is folded into W1 so (x / x_max) @ W1 == x @ (W1 / x_max).
    """
    slab = jnp.zeros((_SLAB_ROWS, _LANE), dtype=jnp.float32)
    w1_scaled = w1.astype(jnp.float32) * inv_scale
    for off, w in ((_W1_OFF, w1_scaled),
                   (_W2_OFF, w2.astype(jnp.float32)),
                   (_W3_OFF, w3.astype(jnp.float32)),
                   (_W4_OFF, w4.astype(jnp.float32))):
        slab = slab.at[off:off + w.shape[0], 0:w.shape[1]].set(w)
    return slab


def _default_batch_tile(B):
    """Largest multiple-of-8 divisor of B that still yields >= 2 grid steps,
    capped at 4096 rows (safe lane-padded VMEM footprint on v7x's 64 MiB)."""
    if B <= 8:
        return B
    limit = min(4096, B // 2)
    best = None
    t = 8
    while t <= limit:
        if B % t == 0:
            best = t
        t += 8
    return best if best is not None else B


def _x_block_spec(TB, nb, n_buf=3):
    """Input BlockSpec; request 3-deep buffering when the grid is deep enough."""
    if nb >= n_buf and hasattr(pl, "Buffered"):
        try:
            return pl.BlockSpec((TB, IN_SIZE), lambda i: (i, 0),
                                pipeline_mode=pl.Buffered(n_buf))
        except TypeError:
            pass  # older BlockSpec signature without pipeline_mode
    return pl.BlockSpec((TB, IN_SIZE), lambda i: (i, 0))


def neural_network_forward(x_raw, w1, w2, w3, w4, *, x_max=None,
                           batch_tile=None, input_dtype=jnp.bfloat16):
    """Forward pass: sigmoid-MLP 42 -> 3 -> 3 -> 3 -> 2, with fused x/x_max.

    Pass `x_max` explicitly whenever possible: the fallback jnp.max(x_raw) is
    a separate XLA reduction that re-reads the whole input from HBM.
    Use input_dtype=jnp.float32 for exact f32 parity with the reference.
    """
    B = x_raw.shape[0]
    TB = _default_batch_tile(B) if batch_tile is None else batch_tile
    if B % TB != 0 or (TB != B and TB % 8 != 0):
        raise ValueError(f"batch_tile={TB} must divide B={B} and be a "
                         f"multiple of 8 (or equal B)")
    nb = B // TB

    if x_max is None:
        # Fallback only: costs an extra full HBM pass over x.
        x_max = jnp.max(x_raw)
    inv_scale = 1.0 / jnp.asarray(x_max, dtype=jnp.float32)

    w_packed = _pack_weights(w1, w2, w3, w4, inv_scale)
    x_in = x_raw.astype(input_dtype)

    # VMEM budget from the lane-padded footprint (x pads 42->128 lanes, the
    # output pads 2->128 lanes), with slack for f32 intermediates.
    itemsize = jnp.dtype(input_dtype).itemsize
    est = (3 * TB * _LANE * itemsize          # x buffers (up to 3-deep)
           + 2 * TB * _LANE * 4               # output double buffer
           + 4 * TB * _LANE * 4               # upcast + z2/z4/z6 intermediates
           + 2 * _SLAB_ROWS * _LANE * 4)      # weight slab (double-buffered)
    vmem_limit = int(min(64 * 1024 * 1024, max(32 * 1024 * 1024, 2 * est)))

    return pl.pallas_call(
        _mlp_kernel,
        out_shape=jax.ShapeDtypeStruct((B, OUT_SIZE), jnp.float32),
        grid=(nb,),
        in_specs=[
            # Batch-tiled activations (bf16 or f32 across HBM->VMEM).
            _x_block_spec(TB, nb),
            # Single packed weight slab, VMEM-resident across all grid steps.
            pl.BlockSpec((_SLAB_ROWS, _LANE), lambda i: (0, 0)),
        ],
        out_specs=pl.BlockSpec((TB, OUT_SIZE), lambda i: (i, 0)),
        compiler_params=pltpu.CompilerParams(
            dimension_semantics=("parallel",),
            vmem_limit_bytes=vmem_limit,
        ),
    )(x_in, w_packed)


def reference_forward(x_raw, w1, w2, w3, w4, x_max):
    x = x_raw / x_max
    s = jax.nn.sigmoid
    return s(s(s(s(x @ w1) @ w2) @ w3) @ w4)


if __name__ == "__main__":
    key = jax.random.PRNGKey(0)
    kx, k1, k2, k3, k4, kx2 = jax.random.split(key, 6)

    # Deterministic "torch.randn"-style weight init (standard normal).
    w1 = jax.random.normal(k1, (IN_SIZE, H1), dtype=jnp.float32)
    w2 = jax.random.normal(k2, (H1, H2), dtype=jnp.float32)
    w3 = jax.random.normal(k3, (H2, H3), dtype=jnp.float32)
    w4 = jax.random.normal(k4, (H3, OUT_SIZE), dtype=jnp.float32)

    # Case 1: toy batch, exact-f32 parity path (single grid step).
    x_small = jax.random.uniform(kx, (8, IN_SIZE), dtype=jnp.float32,
                                 minval=0.0, maxval=10.0)
    x_max_small = jnp.max(x_small)  # caller supplies x_max (no hidden 2nd pass)
    out_small = jax.block_until_ready(
        neural_network_forward(x_small, w1, w2, w3, w4, x_max=x_max_small,
                               input_dtype=jnp.float32))
    ref_small = reference_forward(x_small, w1, w2, w3, w4, x_max_small)
    assert out_small.shape == (8, OUT_SIZE)
    assert jnp.allclose(out_small, ref_small, atol=1e-5, rtol=1e-5)

    # Case 2: multi-step parallel grid, f32 parity (default tile: 128 -> 2 steps).
    x_big = jax.random.uniform(kx2, (256, IN_SIZE), dtype=jnp.float32,
                               minval=0.0, maxval=10.0)
    x_max_big = jnp.max(x_big)
    out_big = jax.block_until_ready(
        neural_network_forward(x_big, w1, w2, w3, w4, x_max=x_max_big,
                               input_dtype=jnp.float32))
    ref_big = reference_forward(x_big, w1, w2, w3, w4, x_max_big)
    assert out_big.shape == (256, OUT_SIZE)
    assert jnp.allclose(out_big, ref_big, atol=1e-5, rtol=1e-5)

    # Case 3: bf16-input fast path, deeper grid (4 tiles of 64 rows, 3-deep
    # input buffering). Looser tolerance due to bf16 input rounding.
    out_bf16 = jax.block_until_ready(
        neural_network_forward(x_big, w1, w2, w3, w4, x_max=x_max_big,
                               batch_tile=64))
    assert out_bf16.shape == (256, OUT_SIZE)
    assert jnp.allclose(out_bf16, ref_big, atol=5e-2, rtol=5e-2)

    print("KERNEL_OK")
</pallas_src>

<mosaic_0001>
module attributes {stable_mosaic.version = 11 : i64} {
  func.func @_mlp_kernel(%arg0: i32, %arg1: memref<8x42xf32, #tpu.memory_space<vmem>>, %arg2: memref<72x128xf32, #tpu.memory_space<vmem>>, %arg3: memref<8x2xf32, #tpu.memory_space<vmem>>) attributes {dimension_semantics = [#tpu.dimension_semantics<parallel>], iteration_bounds = array<i64: 1>, scalar_prefetch = 0 : i64, scratch_operands = 0 : i64, tpu.core_type = #tpu.core_type<tc>, window_params = [{transform_indices = @transform_0, window_bounds = array<i64: 8, 42>}, {pipeline_mode = #tpu.pipeline_mode<synchronous>, transform_indices = @transform_1, window_bounds = array<i64: 72, 128>}, {transform_indices = @transform_2, window_bounds = array<i64: 8, 2>}]} {
    %c0 = arith.constant 0 : index
    %c0_0 = arith.constant 0 : index
    %0 = vector.load %arg1[%c0, %c0_0] : memref<8x42xf32, #tpu.memory_space<vmem>>, vector<8x42xf32>
    %c0_1 = arith.constant 0 : index
    %c0_2 = arith.constant 0 : index
    %1 = vector.load %arg2[%c0_1, %c0_2] : memref<72x128xf32, #tpu.memory_space<vmem>>, vector<72x128xf32>
    %2 = vector.extract_strided_slice %1 {offsets = [0, 0], sizes = [42, 3], strides = [1, 1]} : vector<72x128xf32> to vector<42x3xf32>
    %3 = vector.extract_strided_slice %1 {offsets = [48, 0], sizes = [3, 3], strides = [1, 1]} : vector<72x128xf32> to vector<3x3xf32>
    %4 = vector.extract_strided_slice %1 {offsets = [56, 0], sizes = [3, 3], strides = [1, 1]} : vector<72x128xf32> to vector<3x3xf32>
    %5 = vector.extract_strided_slice %1 {offsets = [64, 0], sizes = [3, 2], strides = [1, 1]} : vector<72x128xf32> to vector<3x2xf32>
    %cst = arith.constant dense<0.000000e+00> : vector<8x3xf32>
    %6 = tpu.matmul %0, %2, %cst {dimension_numbers = #tpu.dot_dimension_numbers<[1], [0], [0], [1], [0, 0, 1, 1], [], []>} : vector<8x42xf32>, vector<42x3xf32>, vector<8x3xf32> -> vector<8x3xf32>
    %7 = arith.negf %6 : vector<8x3xf32>
    %8 = math.exp %7 : vector<8x3xf32>
    %cst_3 = arith.constant 1.000000e+00 : f32
    %9 = vector.broadcast %cst_3 : f32 to vector<8x3xf32>
    %10 = arith.addf %9, %8 : vector<8x3xf32>
    %11 = arith.divf %9, %10 : vector<8x3xf32>
    %cst_4 = arith.constant dense<0.000000e+00> : vector<8x3xf32>
    %12 = tpu.matmul %11, %3, %cst_4 {dimension_numbers = #tpu.dot_dimension_numbers<[1], [0], [0], [1], [0, 0, 1, 1], [], []>} : vector<8x3xf32>, vector<3x3xf32>, vector<8x3xf32> -> vector<8x3xf32>
    %13 = arith.negf %12 : vector<8x3xf32>
    %14 = math.exp %13 : vector<8x3xf32>
    %cst_5 = arith.constant 1.000000e+00 : f32
    %15 = vector.broadcast %cst_5 : f32 to vector<8x3xf32>
    %16 = arith.addf %15, %14 : vector<8x3xf32>
    %17 = arith.divf %15, %16 : vector<8x3xf32>
    %cst_6 = arith.constant dense<0.000000e+00> : vector<8x3xf32>
    %18 = tpu.matmul %17, %4, %cst_6 {dimension_numbers = #tpu.dot_dimension_numbers<[1], [0], [0], [1], [0, 0, 1, 1], [], []>} : vector<8x3xf32>, vector<3x3xf32>, vector<8x3xf32> -> vector<8x3xf32>
    %19 = arith.negf %18 : vector<8x3xf32>
    %20 = math.exp %19 : vector<8x3xf32>
    %cst_7 = arith.constant 1.000000e+00 : f32
    %21 = vector.broadcast %cst_7 : f32 to vector<8x3xf32>
    %22 = arith.addf %21, %20 : vector<8x3xf32>
    %23 = arith.divf %21, %22 : vector<8x3xf32>
    %cst_8 = arith.constant dense<0.000000e+00> : vector<8x2xf32>
    %24 = tpu.matmul %23, %5, %cst_8 {dimension_numbers = #tpu.dot_dimension_numbers<[1], [0], [0], [1], [0, 0, 1, 1], [], []>} : vector<8x3xf32>, vector<3x2xf32>, vector<8x2xf32> -> vector<8x2xf32>
    %25 = arith.negf %24 : vector<8x2xf32>
    %26 = math.exp %25 : vector<8x2xf32>
    %cst_9 = arith.constant 1.000000e+00 : f32
    %27 = vector.broadcast %cst_9 : f32 to vector<8x2xf32>
    %28 = arith.addf %27, %26 : vector<8x2xf32>
    %29 = arith.divf %27, %28 : vector<8x2xf32>
    %c0_10 = arith.constant 0 : index
    %c0_11 = arith.constant 0 : index
    %30 = vector.load %arg3[%c0_10, %c0_11] : memref<8x2xf32, #tpu.memory_space<vmem>>, vector<8x2xf32>
    tpu.vector_store %arg3[%c0_10, %c0_11], %29 {strides = array<i32>} : memref<8x2xf32, #tpu.memory_space<vmem>>, vector<8x2xf32>,
    return
  }
  func.func @transform_0(%arg0: i32) -> (i32, i32) {
    %c0_i32 = arith.constant 0 : i32
    %c0_i32_0 = arith.constant 0 : i32
    return %arg0, %c0_i32 : i32, i32
  }
  func.func @transform_1(%arg0: i32) -> (i32, i32) {
    %c0_i32 = arith.constant 0 : i32
    %c0_i32_0 = arith.constant 0 : i32
    %c0_i32_1 = arith.constant 0 : i32
    return %c0_i32, %c0_i32_0 : i32, i32
  }
  func.func @transform_2(%arg0: i32) -> (i32, i32) {
    %c0_i32 = arith.constant 0 : i32
    %c0_i32_0 = arith.constant 0 : i32
    return %arg0, %c0_i32 : i32, i32
  }
}

</mosaic_0001>

<bundles_post_ra>
// kernel: tpu_custom_call.1
= control target key start
LH: loop header
LB: loop body
LE: loop exit
PB: predicated region body
PF: predicated region fallthrough
CT: control target
= control target key end

     0   :  { %7 = vsyncpa [#allocation3], 0  ;;  %s548_s0 = inlined_call_operand.hbm [shape: f32[8,42], index: 0, kind: input, shape index: {}]   ;;  %s549_s1 = inlined_call_operand.hbm [shape: f32[72,128], index: 1, kind: input, shape index: {}]   ;;  %s550_s2 = inlined_call_operand.vmem [shape: f32[8,2], index: 2, kind: output, shape index: {}]  }
   0x1   :  { %8 = vsyncpa [#allocation5], 0  ;;  %s508_s9 = smov [#allocation2]   ;;  %s509_s11 = smov [#allocation4]  }
   0x2   :  { %s15_s10 = sshll.u32 %s508_s9, 4  ;;  %s24_s12 = sshll.u32 %s509_s11, 4  ;;  %s16_s10 = int_to_ptr.vmem [resolvable:$true] %s15_s10  ;;  %s25_s12 = int_to_ptr.vmem [resolvable:$true] %s24_s12 }
   0x3   :  { %s472_s13 = scalar_lea.vmem %s16_s10, 128  ;;  %p477_p1 = scmp.lt.s32.totalorder %s16_s10, %s16_s10 }
   0x4   :  { %p473_p0 = scmp.ne.s32.totalorder %s16_s10, %s472_s13  ;;  %p478_p2 = scmp.lt.s32.totalorder %s472_s13, %s472_s13 }
   0x6   :  { %p479_p3 = por %p478_p2, %p477_p1 }
   0x8   :  { %p480_p4 = pnand %p479_p3, %p473_p0 }
   0xa   :  { %483 = shalt.err (!%p480_p4)
}
   0xb   :  { %18 = dma.hbm_to_vmem [thread:$0]  %s548_s0, 128, %s16_s10, [#allocation3]  }
   0xc   :  { %s492_s16 = scalar_lea.vmem %s25_s12, 1152  ;;  %p497_p6 = scmp.lt.s32.totalorder %s25_s12, %s25_s12 }
   0xd   :  { %p493_p5 = scmp.ne.s32.totalorder %s25_s12, %s492_s16  ;;  %p498_p7 = scmp.lt.s32.totalorder %s492_s16, %s492_s16 }
   0xf   :  { %p499_p8 = por %p498_p7, %p497_p6 }
  0x11   :  { %p500_p9 = pnand %p499_p8, %p493_p5 }
  0x13   :  { %503 = shalt.err (!%p500_p9)
}
  0x14   :  { %s510_s17 = smov 128   ;;  %s511_s18 = smov 8  }
  0x15   :  { %30 = dma.hbm_to_vmem [thread:$0]  %s549_s1, 1152, %s25_s12, [#allocation5], %s510_s17, %s510_s17, %s511_s18  }
  0x16   :  { %504 = dma.done.wait [#allocation3], 128  }
  0x17   :  { %505 = vsyncadd [#allocation3], 4294967168 }
  0x18   :  { %506 = dma.done.wait [#allocation5], 1152  }
  0x19   :  { %507 = vsyncadd [#allocation5], 4294966144  ;;  %v512_v0 = vmov 0.0   ;;  %vm513_vm0 = vmmov 0   ;;  %vm51_vm1 = vcmask 1041408   ;;  %v43_v1 = vld [vmem:[#allocation4 + $0x28] sm:$0xff] }
  0x1a   :  { %412 = vmatprep.subr.mxu0 %v512_v0  ;;  %424 = vmatprep.mubr.msk.f32.mxu0 %vm513_vm0, %v512_v0  ;;  %v42_v2 = vld [vmem:[#allocation4 + $0x20] sm:$0xff]  ;;  %v41_v3 = vld [vmem:[#allocation4 + $0x18] sm:$0xff]  ;;  %v40_v4 = vld [vmem:[#allocation4 + $0x10] sm:$0xff]  ;;  %vm47_vm2 = vcmask 343040   ;;  %vm135_vm3 = vcmask 1042432   ;;  %vm131_vm4 = vcmask 23552  }
  0x1b   :  { %427 = vmatprep.subr.mxu1 %v512_v0  ;;  %429 = vmatprep.mubr.msk.f32.mxu1 %vm513_vm0, %v512_v0  ;;  %v39_v5 = vld [vmem:[#allocation4 + $0x8] sm:$0xff]  ;;  %v38_v6 = vld [vmem:[#allocation4] sm:$0xff]  ;;  %v37_v7 = vld [vmem:[#allocation2] sm:$0xff]  ;;  %vm379_vm5 = vcmask 15360  }
  0x1c   :  { %413 = vmatpush3.msk.msra.mxu0 %vm51_vm1, %v43_v1  ;;  %v44_v8 = vld [vmem:[#allocation4 + $0x30] sm:$0xff]  ;;  %v45_v15 = vld [vmem:[#allocation4 + $0x38] sm:$0xff]  ;;  %v46_v22 = vld [vmem:[#allocation4 + $0x40] sm:$0xff] }
  0x1d   :  { %414 = vmatprep.subr.mxu0 %v512_v0  ;;  %428 = vmatpush3.msk.msra.mxu1 %vm135_vm3, %v44_v8 }
  0x1e   :  { %415 = vmatpush3.msra.mxu0 %v42_v2  ;;  %432 = vmatprep.subr.mxu1 %v512_v0 }
  0x1f   :  { %416 = vmatprep.subr.mxu0 %v512_v0 }
  0x20   :  { %417 = vmatpush3.msra.mxu0 %v41_v3 }
  0x21   :  { %418 = vmatprep.subr.mxu0 %v512_v0 }
  0x22   :  { %419 = vmatpush3.msra.mxu0 %v40_v4 }
  0x23   :  { %420 = vmatprep.subr.mxu0 %v512_v0 }
  0x24   :  { %421 = vmatpush3.msra.mxu0 %v39_v5 }
  0x25   :  { %422 = vmatprep.subr.mxu0 %v512_v0 }
  0x26   :  { %423 = vmatpush3.msra.mxu0 %v38_v6 }
  0x27   :  { %425 = vmatmul.mubr.msk.f32.vlgmr.msra.gmra.mxu0 %vm47_vm2, %v37_v7 }
  0xe7   :  { %v121_v9 = vpop.f32.mrf.mxu0 }
  0xe8   :  { %v389_v10 = vmul.f32 -1.442695, %v121_v9 }
  0xe9   :  { %v426_v11 = vpop.f32.mrf.mxu0 }
  0xea   :  { %448 = vpow2.f32 %v389_v10 }
  0xf7   :  { %v449_v12 = vpop.eup %448 }
  0xf8   :  { %v128_v13 = vadd.f32 1.0, %v449_v12 }
  0xfa   :  { %450 = vrcp.f32 %v128_v13 }
 0x107   :  { %v451_v14 = vpop.eup %450 }
 0x108   :  { %430 = vmatmul.mubr.msk.f32.vlgmr.msra.gmra.mxu1 %vm131_vm4, %v451_v14 }
 0x109   :  { %434 = vmatprep.mubr.msk.f32.mxu1 %vm513_vm0, %v512_v0  ;;  %433 = vmatpush3.msk.msra.mxu1 %vm135_vm3, %v45_v15 }
 0x10a   :  { %437 = vmatprep.subr.mxu1 %v512_v0 }
 0x1c8   :  { %v205_v16 = vpop.f32.mrf.mxu1 }
 0x1c9   :  { %v392_v17 = vmul.f32 -1.442695, %v205_v16 }
 0x1ca   :  { %v431_v18 = vpop.f32.mrf.mxu1 }
 0x1cb   :  { %452 = vpow2.f32 %v392_v17 }
 0x1d8   :  { %v453_v19 = vpop.eup %452 }
 0x1d9   :  { %v212_v20 = vadd.f32 1.0, %v453_v19 }
 0x1db   :  { %454 = vrcp.f32 %v212_v20 }
 0x1e8   :  { %v455_v21 = vpop.eup %454 }
 0x1e9   :  { %435 = vmatmul.mubr.msk.f32.vlgmr.msra.gmra.mxu1 %vm131_vm4, %v455_v21 }
 0x1ea   :  { %439 = vmatprep.mubr.msk.f32.mxu1 %vm513_vm0, %v512_v0  ;;  %438 = vmatpush3.msk.msra.mxu1 %vm135_vm3, %v46_v22 }
 0x2a9   :  { %v287_v23 = vpop.f32.mrf.mxu1 }
 0x2aa   :  { %v395_v24 = vmul.f32 -1.442695, %v287_v23 }
 0x2ab   :  { %v436_v25 = vpop.f32.mrf.mxu1 }
 0x2ac   :  { %456 = vpow2.f32 %v395_v24 }
 0x2b9   :  { %v457_v26 = vpop.eup %456 }
 0x2ba   :  { %v294_v27 = vadd.f32 1.0, %v457_v26 }
 0x2bc   :  { %458 = vrcp.f32 %v294_v27 }
 0x2c9   :  { %v459_v28 = vpop.eup %458 }
 0x2ca   :  { %440 = vmatmul.mubr.msk.f32.vlgmr.msra.gmra.mxu1 %vm131_vm4, %v459_v28 }
 0x38a   :  { %v369_v29 = vpop.f32.mrf.mxu1 }
 0x38b   :  { %v398_v30 = vmul.f32 -1.442695, %v369_v29 }
 0x38c   :  { %v441_v31 = vpop.f32.mrf.mxu1 }
 0x38d   :  { %460 = vpow2.f32 %v398_v30 }
 0x39a   :  { %v461_v32 = vpop.eup %460 }
 0x39b   :  { %v376_v33 = vadd.f32 1.0, %v461_v32 }
 0x39d   :  { %462 = vrcp.f32 %v376_v33 }
 0x3aa   :  { %v463_v34 = vpop.eup %462 }
 0x3ab   :  { %380 = vst.msk [vmem:[%s550_s2] sm:$0xff] %vm379_vm5, %v463_v34 }
 0x3ac   :  { %385 = vsyncpa [#allocation3], 1 }
 0x3ad   :  { %386 = vsyncpa [#allocation5], 1 }

</bundles_post_ra>
